<compile_context>
chip_gen: v5e
topology: v5e:2x2
jax: 0.10.0
libtpu: 0.0.40
codegen_flags: <defaults>
</compile_context>

<pallas_src>
import functools

import jax
import jax.numpy as jnp
from jax import lax
from jax.experimental import pallas as pl
from jax.experimental.pallas import tpu as pltpu


def _round_up(x, m):
    return ((x + m - 1) // m) * m


def _gelu_exact(x):
    # torch.nn.GELU() default = exact erf-based GELU.
    return 0.5 * x * (1.0 + lax.erf(x * (2.0 ** -0.5)))


def _fcn_forward(x, layers):
    """Plain-JAX MLP: ReLU after every layer except the last (linear) one."""
    for i, (w, b) in enumerate(layers):
        x = jnp.dot(x, w) + b
        if i < len(layers) - 1:
            x = jnp.maximum(x, 0.0)
    return x


# ----------------------------------------------------------------------------
# Fused kernel: trunk MLP tile + h-contraction + output adapter + residual+bias
# One grid step = (batch index b, one tile of P trunk points).
# ----------------------------------------------------------------------------
def _mimonet_kernel(c_ref, t_ref, *rest, trunk_out_widths, O):
    f32 = jnp.float32
    nl = len(trunk_out_widths)
    w_refs = rest[:nl]
    bias_ref = rest[nl]        # (nl, max_w) packed trunk biases
    sel_ref = rest[nl + 1]     # (H*O, O) selection matrix, sel[k,o] = (k%O == o)
    adp_ref = rest[nl + 2]     # (2*O+5, O) packed output adapter
    o_ref = rest[nl + 3]       # (TP, O) output tile

    # ---- trunk MLP on this row tile (MXU; input dtype follows the weights) ---
    t = t_ref[...]                                        # (TP, D_t) f32
    for li in range(nl):
        w = w_refs[li][...]
        b = bias_ref[li:li + 1, 0:trunk_out_widths[li]].astype(f32)
        t = jnp.dot(t.astype(w.dtype), w, preferred_element_type=f32) + b
        if li < nl - 1:
            t = jnp.maximum(t, 0.0)
    # t: (TP, H*O); column k corresponds to (h, o) = (k // O, k % O) — matches
    # torch's `.view(B, P, hidden_dim, num_outputs)` row-major ordering.

    # ---- einsum('bi,bpio->bpo'): sublane-slice c_lane[b], broadcast, contract
    b_idx = pl.program_id(0)
    c_row = c_ref[pl.ds(b_idx, 1), :].astype(f32)         # (1, H*O)
    prod = t * c_row                                      # (TP, H*O)
    out = jnp.dot(prod, sel_ref[...].astype(f32),
                  preferred_element_type=f32)             # (TP, O)

    # ---- output adapter: LayerNorm -> Linear -> GELU -> Linear -> Tanh -------
    adp = adp_ref[...].astype(f32)
    w1 = adp[0:O]
    w2 = adp[O:2 * O]
    ln_g = adp[2 * O:2 * O + 1]
    ln_b = adp[2 * O + 1:2 * O + 2]
    b1 = adp[2 * O + 2:2 * O + 3]
    b2 = adp[2 * O + 3:2 * O + 4]
    bias = adp[2 * O + 4:2 * O + 5]

    mean = jnp.mean(out, axis=-1, keepdims=True)
    var = jnp.mean((out - mean) ** 2, axis=-1, keepdims=True)
    xn = (out - mean) * lax.rsqrt(var + 1e-5) * ln_g + ln_b
    h1 = jnp.dot(xn, w1, preferred_element_type=f32) + b1
    h1 = _gelu_exact(h1)
    h2 = jnp.dot(h1, w2, preferred_element_type=f32) + b2
    h2 = jnp.tanh(h2)

    # TODO(synk): for very large B*P, pack G consecutive rows into a lane-dense
    # (TP//G, G*O) slab before the store to avoid the O/128 masked vst.
    o_ref[...] = (out + h2 + bias).astype(o_ref.dtype)


# ----------------------------------------------------------------------------
# Wrapper: tiny plain-JAX prologue (branches + merge + lane expansion) and a
# single pallas_call over a 2-D (batch, P-tile) parallel grid.
# ----------------------------------------------------------------------------
def mimonet_transform_forward(params, branch_inputs, trunk_input,
                              merge_type="mul", *, trunk_mxu_dtype=jnp.float32):
    if merge_type not in ("mul", "sum"):
        raise ValueError(f"Unsupported merge type: {merge_type}")

    H = params["hidden_dim"]
    O = params["num_outputs"]
    B, P, Dt = trunk_input.shape
    HO = H * O

    # ---- branches + merge + lane expansion (grid-invariant, tiny) -----------
    bouts = [_fcn_forward(x, lp) for x, lp in zip(branch_inputs, params["branch"])]
    combined = bouts[0]
    for bo in bouts[1:]:
        combined = combined * bo if merge_type == "mul" else combined + bo
    # c_lane[b, h*O + o] = combined[b, h]
    c_lane = jnp.repeat(combined.astype(jnp.float32), O, axis=1)   # (B, H*O)
    B_pad = _round_up(B, 8)
    if B_pad != B:
        c_lane = jnp.pad(c_lane, ((0, B_pad - B), (0, 0)))

    # ---- P tiling (batch axis alone already gives >= B parallel grid steps) --
    TP = min(512, _round_up(P, 8))
    P_pad = _round_up(P, TP)
    trunk = trunk_input.astype(jnp.float32)
    if P_pad != P:
        trunk = jnp.pad(trunk, ((0, 0), (0, P_pad - P), (0, 0)))

    trunk_params = params["trunk"]
    nl = len(trunk_params)
    widths = tuple(int(w.shape[1]) for (w, _) in trunk_params)
    assert widths[-1] == HO, "trunk last layer width must equal hidden_dim * num_outputs"
    max_w = _round_up(max(widths), 128)
    bias_packed = jnp.stack(
        [jnp.pad(b, (0, max_w - b.shape[0])) for (_, b) in trunk_params], axis=0)
    trunk_ws = [w.astype(trunk_mxu_dtype) for (w, _) in trunk_params]

    # Selection matrix sel[k, o] = (k % O == o): host-side constant.
    sel = (jnp.arange(HO)[:, None] % O == jnp.arange(O)[None, :]).astype(jnp.float32)
    adp = params["adapter_packed"].astype(jnp.float32)

    args = [c_lane, trunk]
    in_specs = [
        pl.BlockSpec(c_lane.shape, lambda b, p: (0, 0)),            # resident
        pl.BlockSpec((None, TP, Dt), lambda b, p: (b, p, 0)),       # tiled rows
    ]
    for w in trunk_ws:
        args.append(w)
        in_specs.append(pl.BlockSpec(w.shape, lambda b, p: (0, 0)))
    args += [bias_packed, sel, adp]
    in_specs += [pl.BlockSpec(bias_packed.shape, lambda b, p: (0, 0)),
                 pl.BlockSpec(sel.shape, lambda b, p: (0, 0)),
                 pl.BlockSpec(adp.shape, lambda b, p: (0, 0))]

    # ---- explicit VMEM budget (v7x-safe: stay well under a 64 MiB part) -----
    resident = sum(int(a.size) * a.dtype.itemsize for a in args if a is not trunk)
    per_step = 2 * 4 * TP * (Dt + O)        # double-buffered in/out blocks (f32)
    act = 4 * 4 * TP * max_w                # generous in-flight f32 activations
    budget = 2 * resident + per_step + act + (2 << 20)
    assert budget < 48 * 1024 * 1024, budget
    vmem_limit = int(min(48 * 1024 * 1024, max(32 * 1024 * 1024, budget)))

    kernel = functools.partial(_mimonet_kernel, trunk_out_widths=widths, O=O)

    out = pl.pallas_call(
        kernel,
        out_shape=jax.ShapeDtypeStruct((B, P_pad, O), jnp.float32),
        grid=(B, P_pad // TP),
        in_specs=in_specs,
        out_specs=pl.BlockSpec((None, TP, O), lambda b, p: (b, p, 0)),
        compiler_params=pltpu.CompilerParams(
            dimension_semantics=("parallel", "parallel"),
            vmem_limit_bytes=vmem_limit),
    )(*args)

    return out[:, :P, :]


# ----------------------------------------------------------------------------
# Parameter construction (deterministic, synthetic — no checkpoint loading)
# ----------------------------------------------------------------------------
def init_fcn(key, arch):
    params = []
    for i in range(len(arch) - 1):
        key, k_w, k_b = jax.random.split(key, 3)
        bound = 1.0 / (arch[i] ** 0.5)
        w = jax.random.uniform(k_w, (arch[i], arch[i + 1]), jnp.float32, -bound, bound)
        b = jax.random.uniform(k_b, (arch[i + 1],), jnp.float32, -bound, bound)
        params.append((w, b))
    return params


def init_mimonet(key, branch_arch_list, trunk_arch, num_outputs):
    hidden_dim = branch_arch_list[0][-1]
    trunk_arch = list(trunk_arch)
    trunk_arch[-1] = hidden_dim * num_outputs

    keys = jax.random.split(key, len(branch_arch_list) + 4)
    branch_params = [init_fcn(keys[i], arch) for i, arch in enumerate(branch_arch_list)]
    trunk_params = init_fcn(keys[len(branch_arch_list)], trunk_arch)

    O = num_outputs
    bound = 1.0 / (O ** 0.5)
    k1, k2, k3 = keys[-3], keys[-2], keys[-1]
    ln_g = jnp.ones((O,), jnp.float32)
    ln_b = jnp.zeros((O,), jnp.float32)
    w1 = jax.random.uniform(k1, (O, O), jnp.float32, -bound, bound)
    b1 = jax.random.uniform(k2, (O,), jnp.float32, -bound, bound)
    w2 = jax.random.uniform(k3, (O, O), jnp.float32, -bound, bound)
    b2 = jnp.zeros((O,), jnp.float32)
    bias = jnp.zeros((O,), jnp.float32)     # nn.Parameter(torch.zeros(1, 1, num_outputs))

    # Pack the adapter into one small VMEM operand:
    # rows [0:O]=w1, [O:2O]=w2, 2O=ln_g, 2O+1=ln_b, 2O+2=b1, 2O+3=b2, 2O+4=bias
    adapter_packed = jnp.concatenate(
        [w1, w2, ln_g[None], ln_b[None], b1[None], b2[None], bias[None]], axis=0)

    return dict(branch=branch_params, trunk=trunk_params,
                adapter_packed=adapter_packed,
                hidden_dim=hidden_dim, num_outputs=num_outputs)


# ----------------------------------------------------------------------------
# Pure-JAX reference (for in-script correctness check)
# ----------------------------------------------------------------------------
def _reference_forward(params, branch_inputs, trunk_input, merge_type="mul"):
    H = params["hidden_dim"]
    O = params["num_outputs"]
    B, P, Dt = trunk_input.shape
    hp = "highest"

    bouts = [_fcn_forward(x, lp) for x, lp in zip(branch_inputs, params["branch"])]
    combined = bouts[0]
    for bo in bouts[1:]:
        combined = combined * bo if merge_type == "mul" else combined + bo

    t = trunk_input.reshape(B * P, Dt)
    for i, (w, b) in enumerate(params["trunk"]):
        t = jnp.dot(t, w, precision=hp) + b
        if i < len(params["trunk"]) - 1:
            t = jnp.maximum(t, 0.0)
    t = t.reshape(B, P, H, O)
    out = jnp.einsum("bi,bpio->bpo", combined, t, precision=hp)

    adp = params["adapter_packed"]
    w1, w2 = adp[0:O], adp[O:2 * O]
    ln_g, ln_b = adp[2 * O], adp[2 * O + 1]
    b1, b2, bias = adp[2 * O + 2], adp[2 * O + 3], adp[2 * O + 4]

    mean = out.mean(-1, keepdims=True)
    var = ((out - mean) ** 2).mean(-1, keepdims=True)
    xn = (out - mean) * lax.rsqrt(var + 1e-5) * ln_g + ln_b
    h = jnp.dot(xn, w1, precision=hp) + b1
    h = _gelu_exact(h)
    h = jnp.dot(h, w2, precision=hp) + b2
    h = jnp.tanh(h)
    return out + h + bias


if __name__ == "__main__":
    # Small, module-consistent shapes
    B, P, num_outputs = 2, 8, 4
    branch_arch_list = [[16, 32, 32], [8, 32, 32]]   # hidden_dim = 32 -> H*O = 128
    trunk_arch = [3, 32, None]                       # last entry overwritten to H*O

    key = jax.random.PRNGKey(0)
    k_params, k_b0, k_b1, k_t = jax.random.split(key, 4)

    params = init_mimonet(k_params, branch_arch_list, trunk_arch, num_outputs)

    branch_inputs = [
        jax.random.normal(k_b0, (B, branch_arch_list[0][0]), jnp.float32),
        jax.random.normal(k_b1, (B, branch_arch_list[1][0]), jnp.float32),
    ]
    trunk_input = jax.random.normal(k_t, (B, P, trunk_arch[0]), jnp.float32)

    ref = jax.block_until_ready(
        _reference_forward(params, branch_inputs, trunk_input, merge_type="mul"))

    # f32 MXU path (default) — tight tolerance.
    out = mimonet_transform_forward(params, branch_inputs, trunk_input, merge_type="mul")
    out = jax.block_until_ready(out)
    assert out.shape == (B, P, num_outputs), out.shape
    assert bool(jnp.all(jnp.isfinite(out)))
    max_err = float(jnp.max(jnp.abs(out - ref)))
    assert jnp.allclose(out, ref, rtol=1e-4, atol=1e-4), max_err

    # bf16-input trunk MXU path (perf lever on v6e/v7x) — looser tolerance.
    out_bf16 = mimonet_transform_forward(params, branch_inputs, trunk_input,
                                         merge_type="mul",
                                         trunk_mxu_dtype=jnp.bfloat16)
    out_bf16 = jax.block_until_ready(out_bf16)
    assert bool(jnp.all(jnp.isfinite(out_bf16)))
    max_err_bf16 = float(jnp.max(jnp.abs(out_bf16 - ref)))
    assert jnp.allclose(out_bf16, ref, rtol=5e-2, atol=5e-2), max_err_bf16

    print("KERNEL_OK")
</pallas_src>

<mosaic_0001>
module attributes {stable_mosaic.version = 11 : i64} {
  func.func @_mimonet_kernel(%arg0: i32, %arg1: i32, %arg2: memref<8x128xf32, #tpu.memory_space<vmem>>, %arg3: memref<1x8x3xf32, #tpu.memory_space<vmem>>, %arg4: memref<3x32xf32, #tpu.memory_space<vmem>>, %arg5: memref<32x128xf32, #tpu.memory_space<vmem>>, %arg6: memref<2x128xf32, #tpu.memory_space<vmem>>, %arg7: memref<128x4xf32, #tpu.memory_space<vmem>>, %arg8: memref<13x4xf32, #tpu.memory_space<vmem>>, %arg9: memref<1x8x4xf32, #tpu.memory_space<vmem>>) attributes {dimension_semantics = [#tpu.dimension_semantics<parallel>, #tpu.dimension_semantics<parallel>], iteration_bounds = array<i64: 2, 1>, scalar_prefetch = 0 : i64, scratch_operands = 0 : i64, tpu.core_type = #tpu.core_type<tc>, window_params = [{pipeline_mode = #tpu.pipeline_mode<synchronous>, transform_indices = @transform_0, window_bounds = array<i64: 8, 128>}, {transform_indices = @transform_1, window_bounds = array<i64: 1, 8, 3>}, {pipeline_mode = #tpu.pipeline_mode<synchronous>, transform_indices = @transform_2, window_bounds = array<i64: 3, 32>}, {pipeline_mode = #tpu.pipeline_mode<synchronous>, transform_indices = @transform_3, window_bounds = array<i64: 32, 128>}, {pipeline_mode = #tpu.pipeline_mode<synchronous>, transform_indices = @transform_4, window_bounds = array<i64: 2, 128>}, {pipeline_mode = #tpu.pipeline_mode<synchronous>, transform_indices = @transform_5, window_bounds = array<i64: 128, 4>}, {pipeline_mode = #tpu.pipeline_mode<synchronous>, transform_indices = @transform_6, window_bounds = array<i64: 13, 4>}, {transform_indices = @transform_7, window_bounds = array<i64: 1, 8, 4>}]} {
    %c0 = arith.constant 0 : index
    %c0_0 = arith.constant 0 : index
    %c0_1 = arith.constant 0 : index
    %0 = vector.load %arg3[%c0, %c0_0, %c0_1] : memref<1x8x3xf32, #tpu.memory_space<vmem>>, vector<1x8x3xf32>
    %1 = vector.shape_cast %0 : vector<1x8x3xf32> to vector<8x3xf32>
    %c0_2 = arith.constant 0 : index
    %c0_3 = arith.constant 0 : index
    %2 = vector.load %arg4[%c0_2, %c0_3] : memref<3x32xf32, #tpu.memory_space<vmem>>, vector<3x32xf32>
    %c0_4 = arith.constant 0 : index
    %c0_5 = arith.constant 0 : index
    %3 = vector.load %arg6[%c0_4, %c0_5] : memref<2x128xf32, #tpu.memory_space<vmem>>, vector<1x32xf32>
    %cst = arith.constant dense<0.000000e+00> : vector<8x32xf32>
    %4 = tpu.matmul %1, %2, %cst {dimension_numbers = #tpu.dot_dimension_numbers<[1], [0], [0], [1], [0, 0, 1, 1], [], []>} : vector<8x3xf32>, vector<3x32xf32>, vector<8x32xf32> -> vector<8x32xf32>
    %5 = vector.broadcast %3 : vector<1x32xf32> to vector<8x32xf32>
    %6 = arith.addf %4, %5 : vector<8x32xf32>
    %cst_6 = arith.constant 0.000000e+00 : f32
    %7 = vector.broadcast %cst_6 : f32 to vector<8x32xf32>
    %8 = arith.maximumf %6, %7 : vector<8x32xf32>
    %c0_7 = arith.constant 0 : index
    %c0_8 = arith.constant 0 : index
    %9 = vector.load %arg5[%c0_7, %c0_8] : memref<32x128xf32, #tpu.memory_space<vmem>>, vector<32x128xf32>
    %c1 = arith.constant 1 : index
    %c0_9 = arith.constant 0 : index
    %10 = vector.load %arg6[%c1, %c0_9] : memref<2x128xf32, #tpu.memory_space<vmem>>, vector<1x128xf32>
    %cst_10 = arith.constant dense<0.000000e+00> : vector<8x128xf32>
    %11 = tpu.matmul %8, %9, %cst_10 {dimension_numbers = #tpu.dot_dimension_numbers<[1], [0], [0], [1], [0, 0, 1, 1], [], []>} : vector<8x32xf32>, vector<32x128xf32>, vector<8x128xf32> -> vector<8x128xf32>
    %12 = vector.broadcast %10 : vector<1x128xf32> to vector<8x128xf32>
    %13 = arith.addf %11, %12 : vector<8x128xf32>
    %14 = arith.index_cast %arg0 : i32 to index
    %c0_11 = arith.constant 0 : index
    %15 = vector.load %arg2[%14, %c0_11] : memref<8x128xf32, #tpu.memory_space<vmem>>, vector<1x128xf32>
    %16 = vector.broadcast %15 : vector<1x128xf32> to vector<8x128xf32>
    %17 = arith.mulf %13, %16 : vector<8x128xf32>
    %c0_12 = arith.constant 0 : index
    %c0_13 = arith.constant 0 : index
    %18 = vector.load %arg7[%c0_12, %c0_13] : memref<128x4xf32, #tpu.memory_space<vmem>>, vector<128x4xf32>
    %cst_14 = arith.constant dense<0.000000e+00> : vector<8x4xf32>
    %19 = tpu.matmul %17, %18, %cst_14 {dimension_numbers = #tpu.dot_dimension_numbers<[1], [0], [0], [1], [0, 0, 1, 1], [], []>} : vector<8x128xf32>, vector<128x4xf32>, vector<8x4xf32> -> vector<8x4xf32>
    %c0_15 = arith.constant 0 : index
    %c0_16 = arith.constant 0 : index
    %20 = vector.load %arg8[%c0_15, %c0_16] : memref<13x4xf32, #tpu.memory_space<vmem>>, vector<13x4xf32>
    %21 = vector.extract_strided_slice %20 {offsets = [0, 0], sizes = [4, 4], strides = [1, 1]} : vector<13x4xf32> to vector<4x4xf32>
    %22 = vector.extract_strided_slice %20 {offsets = [4, 0], sizes = [4, 4], strides = [1, 1]} : vector<13x4xf32> to vector<4x4xf32>
    %23 = vector.extract_strided_slice %20 {offsets = [8, 0], sizes = [1, 4], strides = [1, 1]} : vector<13x4xf32> to vector<1x4xf32>
    %24 = vector.extract_strided_slice %20 {offsets = [9, 0], sizes = [1, 4], strides = [1, 1]} : vector<13x4xf32> to vector<1x4xf32>
    %25 = vector.extract_strided_slice %20 {offsets = [10, 0], sizes = [1, 4], strides = [1, 1]} : vector<13x4xf32> to vector<1x4xf32>
    %26 = vector.extract_strided_slice %20 {offsets = [11, 0], sizes = [1, 4], strides = [1, 1]} : vector<13x4xf32> to vector<1x4xf32>
    %27 = vector.extract_strided_slice %20 {offsets = [12, 0], sizes = [1, 4], strides = [1, 1]} : vector<13x4xf32> to vector<1x4xf32>
    %cst_17 = arith.constant dense<0.000000e+00> : vector<8xf32>
    %28 = vector.multi_reduction <add>, %19, %cst_17 [1] : vector<8x4xf32> to vector<8xf32>
    %29 = vector.shape_cast %28 : vector<8xf32> to vector<8x1xf32>
    %cst_18 = arith.constant 4.000000e+00 : f32
    %30 = vector.broadcast %cst_18 : f32 to vector<8x1xf32>
    %31 = arith.divf %29, %30 : vector<8x1xf32>
    %32 = vector.broadcast %31 : vector<8x1xf32> to vector<8x4xf32>
    %33 = arith.subf %19, %32 : vector<8x4xf32>
    %34 = arith.mulf %33, %33 : vector<8x4xf32>
    %cst_19 = arith.constant dense<0.000000e+00> : vector<8xf32>
    %35 = vector.multi_reduction <add>, %34, %cst_19 [1] : vector<8x4xf32> to vector<8xf32>
    %36 = vector.shape_cast %35 : vector<8xf32> to vector<8x1xf32>
    %cst_20 = arith.constant 4.000000e+00 : f32
    %37 = vector.broadcast %cst_20 : f32 to vector<8x1xf32>
    %38 = arith.divf %36, %37 : vector<8x1xf32>
    %39 = vector.broadcast %31 : vector<8x1xf32> to vector<8x4xf32>
    %40 = arith.subf %19, %39 : vector<8x4xf32>
    %cst_21 = arith.constant 9.99999974E-6 : f32
    %41 = vector.broadcast %cst_21 : f32 to vector<8x1xf32>
    %42 = arith.addf %38, %41 : vector<8x1xf32>
    %43 = math.rsqrt %42 : vector<8x1xf32>
    %44 = vector.broadcast %43 : vector<8x1xf32> to vector<8x4xf32>
    %45 = arith.mulf %40, %44 : vector<8x4xf32>
    %46 = vector.broadcast %23 : vector<1x4xf32> to vector<8x4xf32>
    %47 = arith.mulf %45, %46 : vector<8x4xf32>
    %48 = vector.broadcast %24 : vector<1x4xf32> to vector<8x4xf32>
    %49 = arith.addf %47, %48 : vector<8x4xf32>
    %cst_22 = arith.constant dense<0.000000e+00> : vector<8x4xf32>
    %50 = tpu.matmul %49, %21, %cst_22 {dimension_numbers = #tpu.dot_dimension_numbers<[1], [0], [0], [1], [0, 0, 1, 1], [], []>} : vector<8x4xf32>, vector<4x4xf32>, vector<8x4xf32> -> vector<8x4xf32>
    %51 = vector.broadcast %25 : vector<1x4xf32> to vector<8x4xf32>
    %52 = arith.addf %50, %51 : vector<8x4xf32>
    %cst_23 = arith.constant 5.000000e-01 : f32
    %53 = vector.broadcast %cst_23 : f32 to vector<8x4xf32>
    %54 = arith.mulf %53, %52 : vector<8x4xf32>
    %cst_24 = arith.constant 0.707106769 : f32
    %55 = vector.broadcast %cst_24 : f32 to vector<8x4xf32>
    %56 = arith.mulf %52, %55 : vector<8x4xf32>
    %57 = math.erf %56 : vector<8x4xf32>
    %cst_25 = arith.constant 1.000000e+00 : f32
    %58 = vector.broadcast %cst_25 : f32 to vector<8x4xf32>
    %59 = arith.addf %58, %57 : vector<8x4xf32>
    %60 = arith.mulf %54, %59 : vector<8x4xf32>
    %cst_26 = arith.constant dense<0.000000e+00> : vector<8x4xf32>
    %61 = tpu.matmul %60, %22, %cst_26 {dimension_numbers = #tpu.dot_dimension_numbers<[1], [0], [0], [1], [0, 0, 1, 1], [], []>} : vector<8x4xf32>, vector<4x4xf32>, vector<8x4xf32> -> vector<8x4xf32>
    %62 = vector.broadcast %26 : vector<1x4xf32> to vector<8x4xf32>
    %63 = arith.addf %61, %62 : vector<8x4xf32>
    %64 = math.tanh %63 : vector<8x4xf32>
    %65 = arith.addf %19, %64 : vector<8x4xf32>
    %66 = vector.broadcast %27 : vector<1x4xf32> to vector<8x4xf32>
    %67 = arith.addf %65, %66 : vector<8x4xf32>
    %c0_27 = arith.constant 0 : index
    %c0_28 = arith.constant 0 : index
    %c0_29 = arith.constant 0 : index
    %68 = vector.load %arg9[%c0_27, %c0_28, %c0_29] : memref<1x8x4xf32, #tpu.memory_space<vmem>>, vector<1x8x4xf32>
    %69 = vector.shape_cast %68 : vector<1x8x4xf32> to vector<8x4xf32>
    %70 = vector.shape_cast %67 : vector<8x4xf32> to vector<1x8x4xf32>
    tpu.vector_store %arg9[%c0_27, %c0_28, %c0_29], %70 {strides = array<i32>} : memref<1x8x4xf32, #tpu.memory_space<vmem>>, vector<1x8x4xf32>,
    return
  }
  func.func @transform_0(%arg0: i32, %arg1: i32) -> (i32, i32) {
    %c0_i32 = arith.constant 0 : i32
    %c0_i32_0 = arith.constant 0 : i32
    %c0_i32_1 = arith.constant 0 : i32
    return %c0_i32, %c0_i32_0 : i32, i32
  }
  func.func @transform_1(%arg0: i32, %arg1: i32) -> (i32, i32, i32) {
    %c0_i32 = arith.constant 0 : i32
    %c0_i32_0 = arith.constant 0 : i32
    return %arg0, %arg1, %c0_i32 : i32, i32, i32
  }
  func.func @transform_2(%arg0: i32, %arg1: i32) -> (i32, i32) {
    %c0_i32 = arith.constant 0 : i32
    %c0_i32_0 = arith.constant 0 : i32
    %c0_i32_1 = arith.constant 0 : i32
    return %c0_i32, %c0_i32_0 : i32, i32
  }
  func.func @transform_3(%arg0: i32, %arg1: i32) -> (i32, i32) {
    %c0_i32 = arith.constant 0 : i32
    %c0_i32_0 = arith.constant 0 : i32
    %c0_i32_1 = arith.constant 0 : i32
    return %c0_i32, %c0_i32_0 : i32, i32
  }
  func.func @transform_4(%arg0: i32, %arg1: i32) -> (i32, i32) {
    %c0_i32 = arith.constant 0 : i32
    %c0_i32_0 = arith.constant 0 : i32
    %c0_i32_1 = arith.constant 0 : i32
    return %c0_i32, %c0_i32_0 : i32, i32
  }
  func.func @transform_5(%arg0: i32, %arg1: i32) -> (i32, i32) {
    %c0_i32 = arith.constant 0 : i32
    %c0_i32_0 = arith.constant 0 : i32
    %c0_i32_1 = arith.constant 0 : i32
    return %c0_i32, %c0_i32_0 : i32, i32
  }
  func.func @transform_6(%arg0: i32, %arg1: i32) -> (i32, i32) {
    %c0_i32 = arith.constant 0 : i32
    %c0_i32_0 = arith.constant 0 : i32
    %c0_i32_1 = arith.constant 0 : i32
    return %c0_i32, %c0_i32_0 : i32, i32
  }
  func.func @transform_7(%arg0: i32, %arg1: i32) -> (i32, i32, i32) {
    %c0_i32 = arith.constant 0 : i32
    %c0_i32_0 = arith.constant 0 : i32
    return %arg0, %arg1, %c0_i32 : i32, i32, i32
  }
}

</mosaic_0001>

<bundles_post_ra>
// kernel: tpu_custom_call.1
= control target key start
LH: loop header
LB: loop body
LE: loop exit
PB: predicated region body
PF: predicated region fallthrough
CT: control target
= control target key end

     0   :  { %s741_s24 = smov 0   ;;  %s743_s25 = smov 0   ;;  %s881_s0 = inlined_call_operand.vmem [shape: f32[8,128], index: 0, kind: input, shape index: {}]   ;;  %s882_s1 = inlined_call_operand.vmem [shape: f32[2,8,3], index: 1, kind: input, shape index: {}]   ;;  %s883_s2 = inlined_call_operand.vmem [shape: f32[3,32], index: 2, kind: input, shape index: {}]   ;;  %s884_s3 = inlined_call_operand.vmem [shape: f32[32,128], index: 3, kind: input, shape index: {}]   ;;  %s885_s4 = inlined_call_operand.vmem [shape: f32[2,128], index: 4, kind: input, shape index: {}]   ;;  %s886_s5 = inlined_call_operand.vmem [shape: f32[128,4], index: 5, kind: input, shape index: {}]   ;;  %s887_s6 = inlined_call_operand.vmem [shape: f32[13,4], index: 6, kind: input, shape index: {}]   ;;  %s888_s7 = inlined_call_operand.vmem [shape: f32[2,8,4], index: 7, kind: output, shape index: {}]  }
   0x1   :  { %s745_s26 = smov 0  }
   0x2 LB: > { %s29_s27 = sadd.s32 1, %s694_s25  ;;  %p627_p0 = scmp.ge.s32.totalorder %s698_s26, 1  ;;  %s698_s26 = sphi %s745_s26, %s17_s26   ;;  %s694_s25 = sphi %s743_s25, %s890_s25   ;;  %s690_s24 = sphi %s741_s24, %s889_s24  }
   0x3   : > { %p31_p1 = scmp.ge.s32.totalorder %s29_s27, 2  ;;  %p255_p2 = scmp.lt.s32.totalorder %s698_s26, 3 }
   0x5   : > { %s892_s27 = smov (%p31_p1, %s29_s27), 0  ;;  %p256_p3 = pnand %p627_p0, %p255_p2 }
   0x6   : > { %p291_p4 = scmp.lt.s32.totalorder (!%p256_p3), %s690_s24, 1  ;;  %s368_s16 = scalar_lea.vmem (!%p256_p3), %s881_s0, %s690_s24 }
   0x7   : > { %259 = sbr.rel (%p256_p3) target bundleno = 1002 (0x3ea), region = 48 }
   0xc   : > { %v306_v0 = vld [vmem:[%s883_s2] sm:$0x7]  ;;  %vm313_vm0 = vcmask 1042432   ;;  %v341_v1 = vld [vmem:[%s884_s3 + $0x18] sm:$0xff]  ;;  %s769_s9 = scalar_select %p291_p4, %s690_s24, 1  ;;  %vm309_vm1 = vcmask 23552  }
   0xd   : > { %630 = vmatpush.msk.msra.mxu0 %vm313_vm0, %v306_v0  ;;  %360 = vmatpush.msra.mxu1 %v341_v1  ;;  %v340_v3 = vld [vmem:[%s884_s3 + $0x10] sm:$0xff]  ;;  %v339_v4 = vld [vmem:[%s884_s3 + $0x8] sm:$0xff]  ;;  %v338_v5 = vld [vmem:[%s884_s3] sm:$0xff]  ;;  %vm344_vm2 = vcmask 261120   ;;  %vm410_vm3 = vcmask 31744   ;;  %v700_v33 = vmov 4.0  }
   0xe   : > { %s628_s10 = sshll.u32 %s769_s9, 3  ;;  %v387_v6 = vld [vmem:[%s886_s5 + $0x78] sm:$0xff]  ;;  %v386_v7 = vld [vmem:[%s886_s5 + $0x70] sm:$0xff]  ;;  %v385_v8 = vld [vmem:[%s886_s5 + $0x68] sm:$0xff]  ;;  %668 = vrcp.f32 %v700_v33  ;;  %vm448_vm5 = vcmask 1043456  }
   0xf   : > { %s297_s13 = scalar_lea.vmem %s882_s1, %s628_s10  ;;  %361 = vmatpush.msra.mxu1 %v340_v3  ;;  %388 = vmatpush.msra.mxu2 %v387_v6  ;;  %v384_v9 = vld [vmem:[%s886_s5 + $0x60] sm:$0xff]  ;;  %v383_v10 = vld [vmem:[%s886_s5 + $0x58] sm:$0xff]  ;;  %v382_v11 = vld [vmem:[%s886_s5 + $0x50] sm:$0xff] }
  0x10   : > { %v305_v2 = vld [vmem:[%s297_s13] sm:$0xff]  ;;  %v381_v12 = vld [vmem:[%s886_s5 + $0x48] sm:$0xff]  ;;  %v379_v14 = vld [vmem:[%s886_s5 + $0x38] sm:$0xff]  ;;  %s304_s13 = scalar_lea.vmem %s888_s7, %s628_s10 }
  0x11   : > { %631 = vmatmul.msk.f32.vlgmr.msra.gmra.mxu0 %vm309_vm1, %v305_v2  ;;  %362 = vmatpush.msra.mxu1 %v339_v4  ;;  %v380_v13 = vld [vmem:[%s886_s5 + $0x40] sm:$0xff]  ;;  %v378_v15 = vld [vmem:[%s886_s5 + $0x30] sm:$0xff]  ;;  %v377_v16 = vld [vmem:[%s886_s5 + $0x28] sm:$0xff] }
  0x12   : > { %389 = vmatpush.msra.mxu2 %v386_v7  ;;  %v376_v17 = vld [vmem:[%s886_s5 + $0x20] sm:$0xff]  ;;  %v375_v18 = vld [vmem:[%s886_s5 + $0x18] sm:$0xff]  ;;  %v374_v23 = vld [vmem:[%s886_s5 + $0x10] sm:$0xff] }
  0x13   : > { %363 = vmatpush.msra.mxu1 %v338_v5  ;;  %v665_v19 = vld [vmem:[%s885_s4] ss:$0 sm:$0xff]  ;;  %v373_v24 = vld [vmem:[%s886_s5 + $0x8] sm:$0xff]  ;;  %v666_v26 = vld [vmem:[%s885_s4 + $0x1] ss:$0 sm:$0xff] }
  0x14   : > { %390 = vmatpush.msra.mxu2 %v385_v8  ;;  %v372_v25 = vld [vmem:[%s886_s5] sm:$0xff]  ;;  %v669_v34 = vpop.eup %668  ;;  %v856_v55 = vld [vmem:[%s887_s6 + $0x8] sm:$0x1f] }
  0x15   : > { %v667_v27 = vld [vmem:[%s368_s16] ss:$0 sm:$0xff]  ;;  %v415_v35 = vmul.f32 4.0, %v669_v34  ;;  %vm419_vm4 = vweird.f32 %v669_v34  ;;  %v440_v57 = vperm.slane %v856_v55, 0  ;;  %v442_v60 = vperm.slane %v856_v55, 1 }
  0x16   : > { %391 = vmatpush.msra.mxu2 %v384_v9  ;;  %v408_v45 = vld [vmem:[%s887_s6] sm:$0xff]  ;;  %v444_v63 = vperm.slane %v856_v55, 2 }
  0x17   : > { %v416_v36 = vsub.f32 1.0, %v415_v35  ;;  %633 = vmatpush.msk.msra.mxu3 %vm448_vm5, %v408_v45  ;;  %v517_v46 = vrot.slane %v408_v45, 4  ;;  %v545_v45 = vperm.slane %v856_v55, 4 }
  0x18   : > { %392 = vmatpush.msra.mxu2 %v383_v10 }
  0x19   : > { %v417_v37 = vmul.f32 %v669_v34, %v416_v36  ;;  %636 = vmatpush.msk.msrb.mxu0 %vm448_vm5, %v517_v46 }
  0x1a   : > { %393 = vmatpush.msra.mxu2 %v382_v11 }
  0x1b   : > { %v418_v38 = vadd.f32 %v669_v34, %v417_v37 }
  0x1c   : > { %394 = vmatpush.msra.mxu2 %v381_v12 }
  0x1d   : > { %v420_v39 = vsel %vm419_vm4, %v669_v34, %v418_v38 }
  0x1e   : > { %395 = vmatpush.msra.mxu2 %v380_v13 }
  0x20   : > { %396 = vmatpush.msra.mxu2 %v379_v14 }
  0x22   : > { %397 = vmatpush.msra.mxu2 %v378_v15 }
  0x24   : > { %398 = vmatpush.msra.mxu2 %v377_v16 }
  0x26   : > { %399 = vmatpush.msra.mxu2 %v376_v17 }
  0x28   : > { %400 = vmatpush.msra.mxu2 %v375_v18 }
  0x2a   : > { %401 = vmatpush.msra.mxu2 %v374_v23 }
  0x2c   : > { %402 = vmatpush.msra.mxu2 %v373_v24 }
  0x2e   : > { %403 = vmatpush.msra.mxu2 %v372_v25 }
  0x8e   : > { %v334_v20 = vpop.f32.mrf.mxu0 }
  0x8f   : > { %v335_v21 = vadd.f32 %v665_v19, %v334_v20 }
  0x91   : > { %v337_v22 = vmax.f32 %v335_v21, 0.0 }
  0x93   : > { %632 = vmatmul.msk.f32.vlgmr.msra.gmra.mxu1 %vm344_vm2, %v337_v22 }
 0x110   : > { %v365_v28 = vpop.f32.mrf.mxu1 }
 0x111   : > { %v366_v29 = vadd.f32 %v666_v26, %v365_v28 }
 0x113   : > { %v371_v30 = vmul.f32 %v667_v27, %v366_v29 }
 0x115   : > { %404 = vmatmul.f32.vlgmr.msra.gmra.mxu2 %v371_v30 }
 0x198   : > { %v844_v31 = vpop.f32.mrf.mxu2 }
 0x199   : > { %v411_v32 = vsel %vm410_vm3, %v844_v31, 0.0 }
 0x19a   : > { %412 = vadd.xlane.f32.xlu0 %v411_v32 }
 0x20d   : > { %v413_v40 = vpop.xlane.xlu0 %412 }
 0x20e   : > { %v421_v41 = vmul.f32 %v420_v39, %v413_v40 }
 0x210   : > { %v422_v42 = vsub.f32 %v844_v31, %v421_v41 }
 0x212   : > { %v423_v43 = vmul.f32 %v422_v42, %v422_v42 }
 0x214   : > { %v424_v44 = vsel %vm410_vm3, %v423_v43, 0.0 }
 0x215   : > { %425 = vadd.xlane.f32.xlu0 %v424_v44 }
 0x288   : > { %v426_v47 = vpop.xlane.xlu0 %425 }
 0x289   : > { %v427_v48 = vmul.f32 %v426_v47, %v420_v39 }
 0x28b   : > { %v428_v49 = vadd.f32 1e-05, %v427_v48 }
 0x28d   : > { %670 = vrsqrt.f32 %v428_v49  ;;  %vm435_vm7 = vweird.f32 %v428_v49 }
 0x293   : > { %v671_v50 = vpop.eup %670 }
 0x294   : > { %v430_v51 = vmul.f32 %v671_v50, %v428_v49  ;;  %vm436_vm6 = vweird.f32 %v671_v50 }
 0x295   : > { %vm437_vm8 = vmor %vm435_vm7, %vm436_vm6 }
 0x296   : > { %v431_v52 = vmul.f32 %v671_v50, %v430_v51 }
 0x298   : > { %v432_v53 = vmul.f32 0.5, %v431_v52 }
 0x29a   : > { %v433_v54 = vsub.f32 1.5, %v432_v53 }
 0x29c   : > { %v434_v56 = vmul.f32 %v671_v50, %v433_v54 }
 0x29e   : > { %v438_v58 = vsel %vm437_vm8, %v671_v50, %v434_v56 }
 0x29f   : > { %v439_v59 = vmul.f32 %v438_v58, %v422_v42  ;;  %v516_v42 = vperm.slane %v856_v55, 3 }
 0x2a1   : > { %v441_v61 = vmul.f32 %v440_v57, %v439_v59 }
 0x2a3   : > { %v443_v62 = vadd.f32 %v442_v60, %v441_v61 }
 0x2a5   : > { %634 = vmatmul.msk.f32.vlgmr.msra.gmra.mxu3 %vm410_vm3, %v443_v62 }
 0x328   : > { %v469_v0 = vpop.f32.mrf.mxu3 }
 0x329   : > { %v470_v1 = vadd.f32 %v469_v0, %v444_v63 }
 0x32b   : > { %v473_v2 = vmul.f32 0.70710677, %v470_v1  ;;  %v472_v39 = vmul.f32 0.5, %v470_v1 }
 0x32d   : > { %v474_v3 = vmul.f32 %v473_v2, %v473_v2 }
 0x32f   : > { %v475_v4 = vmin.f32 %v474_v3, 16.0 }
 0x331   : > { %v476_v5 = vmul.f32 2.1237322e-06, %v475_v4  ;;  %v487_v6 = vmul.f32 3.8918573e-05, %v475_v4 }
 0x333   : > { %v477_v7 = vadd.f32 0.00028619796, %v476_v5  ;;  %v488_v8 = vadd.f32 0.001143296, %v487_v6 }
 0x335   : > { %v478_v9 = vmul.f32 %v477_v7, %v475_v4  ;;  %v489_v10 = vmul.f32 %v488_v8, %v475_v4 }
 0x337   : > { %v490_v11 = vadd.f32 0.014752088, %v489_v10  ;;  %v479_v12 = vadd.f32 0.0036580483, %v478_v9 }
 0x339   : > { %v491_v13 = vmul.f32 %v490_v11, %v475_v4  ;;  %v480_v15 = vmul.f32 %v479_v12, %v475_v4 }
 0x33b   : > { %v492_v14 = vadd.f32 0.112945676, %v491_v13  ;;  %v481_v18 = vadd.f32 0.05243302, %v480_v15 }
 0x33d   : > { %v493_v16 = vmul.f32 %v492_v14, %v475_v4  ;;  %v482_v21 = vmul.f32 %v481_v18, %v475_v4 }
 0x33f   : > { %v494_v17 = vadd.f32 0.4994258, %v493_v16  ;;  %v483_v22 = vadd.f32 0.18741608, %v482_v21 }
 0x341   : > { %v495_v19 = vmul.f32 %v494_v17, %v475_v4  ;;  %v484_v24 = vmul.f32 %v483_v22, %v475_v4 }
 0x343   : > { %v496_v20 = vadd.f32 1.0, %v495_v19  ;;  %v485_v28 = vadd.f32 1.1283791, %v484_v24 }
 0x345   : > { %672 = vrcp.f32 %v496_v20  ;;  %v508_v27 = vand.u32 2147483648, %v496_v20  ;;  %v506_v30 = vand.u32 2147483647, %v496_v20  ;;  %vm502_vm10 = vweird.f32 %v496_v20 }
 0x346   : > { %v486_v34 = vmul.f32 %v485_v28, %v473_v2 }
 0x347   : > { %v509_v33 = vor.u32 1.1754944e-38, %v508_v27  ;;  %vm507_vm12 = vcmp.eq.f32.partialorder %v506_v30, 8.507059e+37 }
 0x34b   : > { %v673_v23 = vpop.eup %672 }
 0x34c   : > { %v498_v25 = vmul.f32 %v673_v23, %v496_v20  ;;  %vm503_vm9 = vweird.f32 %v673_v23 }
 0x34d   : > { %vm504_vm11 = vmor %vm502_vm10, %vm503_vm9 }
 0x34e   : > { %v499_v26 = vsub.f32 1.0, %v498_v25 }
 0x350   : > { %v500_v29 = vmul.f32 %v673_v23, %v499_v26 }
 0x352   : > { %v501_v32 = vadd.f32 %v673_v23, %v500_v29 }
 0x354   : > { %v505_v35 = vsel %vm504_vm11, %v673_v23, %v501_v32 }
 0x355   : > { %v510_v36 = vsel %vm507_vm12, %v509_v33, %v505_v35 }
 0x356   : > { %v511_v37 = vmul.f32 %v510_v36, %v486_v34 }
 0x358   : > { %v635_v38 = vclamps-f32 %v511_v37, 1.0 }
 0x35a   : > { %v514_v40 = vadd.f32 1.0, %v635_v38 }
 0x35c   : > { %v515_v41 = vmul.f32 %v514_v40, %v472_v39 }
 0x35e   : > { %637 = vmatmul.msk.f32.vlgmr.msrb.gmra.mxu0 %vm410_vm3, %v515_v41 }
 0x3db   : > { %v540_v43 = vpop.f32.mrf.mxu0 }
 0x3dc   : > { %v541_v44 = vadd.f32 %v540_v43, %v516_v42 }
 0x3de   : > { %674 = vtanh.f32 %v541_v44 }
 0x3e4   : > { %v675_v46 = vpop.eup %674 }
 0x3e5   : > { %v544_v47 = vadd.f32 %v675_v46, %v844_v31 }
 0x3e7   : > { %v546_v48 = vadd.f32 %v545_v45, %v544_v47 }
 0x3e9   : > { %547 = vst.msk [vmem:[%s304_s13] sm:$0xff] %vm410_vm3, %v546_v48 }
 0x3ea PF: > { %s17_s26 = sadd.s32 1, %s698_s26   ;;  %s889_s24 = smov %s694_s25 }
 0x3eb   : > { %p14_p5 = scmp.ge.s32.totalorder %s17_s26, 4   ;;  %s890_s25 = smov %s892_s27 }
 0x3ed   :  { %16 = sbr.rel (!%p14_p5) target bundleno = 2 (0x2), region = 79 }

</bundles_post_ra>
